<compile_context>
chip_gen: v7x
topology: tpu7x:2x2x1
jax: 0.10.0
libtpu: 0.0.40
codegen_flags: <defaults>
</compile_context>

<pallas_src>
import math
import numpy as np
import jax
import jax.numpy as jnp
from jax.experimental import pallas as pl
from jax.experimental.pallas import tpu as pltpu


# ----------------------------------------------------------------------------
# Pallas kernel.  Batch is on the LANE axis.
#   xe_ref : (Fp, TB)   [features ; ones(bias) ; zero pad] x batch-tile
#   ct_ref : (2D, Fp)   duplicated encoding coefficients + bias column
#   q_ref  : (2D, 2D)   symmetric packed observable  [[Mr,-Mi],[Mi,Mr]]/D
#   out_ref: (1, TB)    <Z_0> per column (lane-dense)
# ----------------------------------------------------------------------------
def _vqc_kernel(xe_ref, ct_ref, q_ref, out_ref):
    phase = jnp.dot(ct_ref[...], xe_ref[...],
                    preferred_element_type=jnp.float32)      # (2D, TB)
    p = jnp.cos(phase)                                       # [cos(phi); sin(phi)]
    qp = jnp.dot(q_ref[...], p,
                 preferred_element_type=jnp.float32)         # (2D, TB)
    # <Z0>_b = p_b^T Q p_b  (Q symmetric) -> sublane reduce, lane-dense result
    out_ref[...] = jnp.sum(p * qp, axis=0, keepdims=True)    # (1, TB)


def _pick_batch_tile(batch, d2, fp):
    """Largest lane (batch) tile whose steady-state VMEM footprint fits comfortably."""
    # f32 bytes resident per lane column: phase/p/qp temporaries + double-buffered
    # x block + output block.
    per_col = (3 * d2 + 2 * fp) * 4 + 8
    try:
        vmem = int(pltpu.get_tpu_info().vmem_capacity_bytes)
    except Exception:
        vmem = 64 << 20                      # conservative: v7x per-TensorCore VMEM
    const_bytes = d2 * d2 * 4 + d2 * fp * 4  # VMEM-resident Q and Ct2
    budget = max(vmem // 4 - const_bytes, 512 * per_col)
    cap = min(budget // per_col, 16384)
    tb = max((cap // 512) * 512, 512)
    bp_small = -(-batch // 128) * 128        # small batch: one lane-aligned tile
    return bp_small if bp_small <= tb else tb


def explicit_circuit_forward(x, ct2, q):
    """x: (B, F) float32, ct2: (2D, Fp) float32, q: (2D, 2D) float32 -> (B, 1) float32."""
    B, F = x.shape
    d2, fp = ct2.shape
    assert fp >= F + 1, "ct2 must have room for the bias column"

    TB = _pick_batch_tile(B, d2, fp)
    Bp = ((B + TB - 1) // TB) * TB

    # Features-major, bias-augmented, batch/feature-padded input (one fused XLA op).
    x_ext = jnp.concatenate(
        [x.T.astype(jnp.float32), jnp.ones((1, B), jnp.float32)], axis=0)  # (F+1, B)
    x_ext = jnp.pad(x_ext, ((0, fp - (F + 1)), (0, Bp - B)))               # (Fp, Bp)

    out = pl.pallas_call(
        _vqc_kernel,
        out_shape=jax.ShapeDtypeStruct((1, Bp), jnp.float32),
        grid=(Bp // TB,),
        in_specs=[
            pl.BlockSpec((fp, TB), lambda i: (0, i)),     # batch-tiled input
            pl.BlockSpec((d2, fp), lambda i: (0, 0)),     # VMEM-resident constants
            pl.BlockSpec((d2, d2), lambda i: (0, 0)),
        ],
        out_specs=pl.BlockSpec((1, TB), lambda i: (0, i)),
        compiler_params=pltpu.CompilerParams(
            dimension_semantics=("parallel",),
            vmem_limit_bytes=32 << 20,        # headroom for the 16K-column tile on v5e
        ),
    )(x_ext, ct2, q)

    return out[0, :B][:, None]                             # (B, 1)


# ----------------------------------------------------------------------------
# Parameter-setup glue (numpy): encoding coefficients, trainable unitary, and
# the packed matrices handed to the kernel.
# ----------------------------------------------------------------------------
_I2 = np.eye(2, dtype=np.complex128)
_X = np.array([[0, 1], [1, 0]], dtype=np.complex128)
_Y = np.array([[0, -1j], [1j, 0]], dtype=np.complex128)
_Z = np.array([[1, 0], [0, -1]], dtype=np.complex128)


def _bits(n_qubits):
    D = 2 ** n_qubits
    s = np.arange(D)
    # wire 0 == most-significant bit (PennyLane convention)
    return np.stack([(s >> (n_qubits - 1 - i)) & 1 for i in range(n_qubits)])  # (n, D)


def build_encoding_matrix(n_qubits):
    """C[f, s] such that phase(b, s) = (x @ C)[b, s]."""
    n = n_qubits
    D = 2 ** n
    F = n + n * (n - 1) // 2
    bits = _bits(n)
    z = 1 - 2 * bits
    C = np.zeros((F, D), dtype=np.float64)
    for i in range(n):
        C[i] = bits[i]                          # PhaseShift(x_i): +x_i on |1>_i
    count = 0
    for i in range(n):
        for j in range(i + 1, n):
            C[n + count] = -0.5 * z[i] * z[j]   # IsingZZ(x_ij): exp(-i x/2 Z_i Z_j)
            count += 1
    return C


def build_ct2(C):
    """(2D, Fp): rows duplicated for [cos; sin], bias column (-pi/2 on the sin half),
    feature axis zero-padded to a sublane multiple so the x DMA is unmasked."""
    F, D = C.shape
    Fp = ((F + 1 + 7) // 8) * 8
    ct2 = np.zeros((2 * D, Fp), dtype=np.float64)
    ct2[:D, :F] = C.T
    ct2[D:, :F] = C.T
    ct2[D:, F] = -np.pi / 2                     # sin(x) = cos(x - pi/2)
    return ct2


def _embed_pauli(pauli_on_wire, n_qubits):
    op = np.array([[1.0 + 0j]])
    for w in range(n_qubits):
        op = np.kron(op, pauli_on_wire.get(w, _I2))
    return op


def _rot(theta, pauli_full, D):
    # exp(-i theta/2 P), P^2 = I
    return math.cos(theta / 2) * np.eye(D, dtype=np.complex128) \
        - 1j * math.sin(theta / 2) * pauli_full


def _cz_full(a, b, n_qubits):
    bits = _bits(n_qubits)
    diag = np.where((bits[a] & bits[b]) == 1, -1.0, 1.0).astype(np.complex128)
    return np.diag(diag)


def build_trainable_unitary(weights, n_qubits, n_layers, heisenberg, use_noise=0.0):
    w = np.asarray(weights, dtype=np.float64)
    n, D = n_qubits, 2 ** n_qubits
    U = np.eye(D, dtype=np.complex128)
    p = 0
    if heisenberg:
        for _ in range(n_layers):
            for i in range(n):
                j = (i + 1) % n
                for off, P in enumerate((_X, _Y, _Z)):
                    Pf = _embed_pauli({i: P, j: P}, n)
                    U = _rot(w[p + off], Pf, D) @ U
                p += 3
    else:
        def rot_block(U, p):
            for i in range(n):
                for off, P in enumerate((_X, _Y, _Z)):
                    U = _rot(w[p + off], _embed_pauli({i: P}, n), D) @ U
                p += 3
            return U, p
        for _ in range(n_layers - 1):
            U, p = rot_block(U, p)
            for i in range(n - 1):
                U = _cz_full(i, i + 1, n) @ U
            if n > 2:
                U = _cz_full(0, n - 1, n) @ U
        U, p = rot_block(U, p)

    if use_noise > 0:
        # TODO(synk): reference uses torch.rand per forward call; we use a fixed numpy
        # RNG seed here, so noise realizations differ from the PyTorch module.
        rng = np.random.default_rng(0)
        for i in range(n):
            ang = np.pi * use_noise * rng.random()
            U = _rot(ang, _embed_pauli({i: _X}, n), D) @ U
    return U


def build_z0(n_qubits):
    bits = _bits(n_qubits)
    return (1 - 2 * bits[0]).astype(np.float64)                    # (D,)


def build_packed_observable(U, z_diag):
    """Q = [[Re M, -Im M], [Im M, Re M]] / D  with  M = U^H diag(z) U (Hermitian).

    Folds the observable, the complex arithmetic and the 1/sqrt(D)^2 normalization
    into a single symmetric real (2D, 2D) matrix for the kernel's second matmul.
    """
    D = U.shape[0]
    M = U.conj().T @ (z_diag[:, None] * U)
    Mr, Mi = np.real(M), np.imag(M)
    Q = np.block([[Mr, -Mi], [Mi, Mr]]) / float(D)
    return Q


# ----------------------------------------------------------------------------
if __name__ == "__main__":
    n_qubits, n_layers, use_noise = 4, 3, 0.0
    batch = 8
    n_features = n_qubits + n_qubits * (n_qubits - 1) // 2        # 10
    n_params = 3 * n_layers * n_qubits                            # 36
    D = 2 ** n_qubits

    key = jax.random.PRNGKey(0)
    kx, kw = jax.random.split(key)
    x = jax.random.uniform(kx, (batch, n_features), jnp.float32,
                           minval=-np.pi, maxval=np.pi)
    # TorchLayer default init: uniform(0, 2*pi)
    weights = jax.random.uniform(kw, (n_params,), jnp.float32,
                                 minval=0.0, maxval=2.0 * np.pi)

    C = build_encoding_matrix(n_qubits)                           # (F, D) float64
    Ct2 = jnp.asarray(build_ct2(C), dtype=jnp.float32)            # (2D, Fp)
    z0 = build_z0(n_qubits)                                       # (D,)

    for heisenberg in (False, True):
        # Host-side parameter setup (numpy glue).
        U = build_trainable_unitary(np.asarray(weights), n_qubits, n_layers,
                                    heisenberg, use_noise)
        Q = jnp.asarray(build_packed_observable(U, z0), dtype=jnp.float32)  # (2D, 2D)

        out = explicit_circuit_forward(x, Ct2, Q)                 # (batch, 1)
        out = jax.block_until_ready(out)
        assert out.shape == (batch, 1)

        # Plain-numpy reference of the same statevector math (sanity check).
        xn = np.asarray(x, dtype=np.float64)
        phase = xn @ C
        psi = np.exp(1j * phase) / math.sqrt(D)
        final = psi @ U.T
        ref = np.sum((np.abs(final) ** 2) * z0[None, :], axis=-1, keepdims=True)
        np.testing.assert_allclose(np.asarray(out, dtype=np.float64), ref,
                                   rtol=1e-4, atol=3e-4)

    print("KERNEL_OK")
</pallas_src>

<mosaic_0001>
module attributes {stable_mosaic.version = 11 : i64} {
  func.func @_vqc_kernel(%arg0: i32, %arg1: memref<16x128xf32, #tpu.memory_space<vmem>>, %arg2: memref<32x16xf32, #tpu.memory_space<vmem>>, %arg3: memref<32x32xf32, #tpu.memory_space<vmem>>, %arg4: memref<1x128xf32, #tpu.memory_space<vmem>>) attributes {dimension_semantics = [#tpu.dimension_semantics<parallel>], iteration_bounds = array<i64: 1>, scalar_prefetch = 0 : i64, scratch_operands = 0 : i64, tpu.core_type = #tpu.core_type<tc>, window_params = [{transform_indices = @transform_0, window_bounds = array<i64: 16, 128>}, {pipeline_mode = #tpu.pipeline_mode<synchronous>, transform_indices = @transform_1, window_bounds = array<i64: 32, 16>}, {pipeline_mode = #tpu.pipeline_mode<synchronous>, transform_indices = @transform_2, window_bounds = array<i64: 32, 32>}, {transform_indices = @transform_3, window_bounds = array<i64: 1, 128>}]} {
    %c0 = arith.constant 0 : index
    %c0_0 = arith.constant 0 : index
    %0 = vector.load %arg2[%c0, %c0_0] : memref<32x16xf32, #tpu.memory_space<vmem>>, vector<32x16xf32>
    %c0_1 = arith.constant 0 : index
    %c0_2 = arith.constant 0 : index
    %1 = vector.load %arg1[%c0_1, %c0_2] : memref<16x128xf32, #tpu.memory_space<vmem>>, vector<16x128xf32>
    %cst = arith.constant dense<0.000000e+00> : vector<32x128xf32>
    %2 = tpu.matmul %0, %1, %cst {dimension_numbers = #tpu.dot_dimension_numbers<[1], [0], [0], [1], [0, 0, 1, 1], [], []>} : vector<32x16xf32>, vector<16x128xf32>, vector<32x128xf32> -> vector<32x128xf32>
    %3 = math.cos %2 : vector<32x128xf32>
    %c0_3 = arith.constant 0 : index
    %c0_4 = arith.constant 0 : index
    %4 = vector.load %arg3[%c0_3, %c0_4] : memref<32x32xf32, #tpu.memory_space<vmem>>, vector<32x32xf32>
    %cst_5 = arith.constant dense<0.000000e+00> : vector<32x128xf32>
    %5 = tpu.matmul %4, %3, %cst_5 {dimension_numbers = #tpu.dot_dimension_numbers<[1], [0], [0], [1], [0, 0, 1, 1], [], []>} : vector<32x32xf32>, vector<32x128xf32>, vector<32x128xf32> -> vector<32x128xf32>
    %6 = arith.mulf %3, %5 : vector<32x128xf32>
    %cst_6 = arith.constant dense<0.000000e+00> : vector<128xf32>
    %7 = vector.multi_reduction <add>, %6, %cst_6 [0] : vector<32x128xf32> to vector<128xf32>
    %8 = vector.shape_cast %7 : vector<128xf32> to vector<1x128xf32>
    %c0_7 = arith.constant 0 : index
    %c0_8 = arith.constant 0 : index
    %9 = vector.load %arg4[%c0_7, %c0_8] : memref<1x128xf32, #tpu.memory_space<vmem>>, vector<1x128xf32>
    tpu.vector_store %arg4[%c0_7, %c0_8], %8 {strides = array<i32>} : memref<1x128xf32, #tpu.memory_space<vmem>>, vector<1x128xf32>,
    return
  }
  func.func @transform_0(%arg0: i32) -> (i32, i32) {
    %c0_i32 = arith.constant 0 : i32
    %c0_i32_0 = arith.constant 0 : i32
    return %c0_i32, %arg0 : i32, i32
  }
  func.func @transform_1(%arg0: i32) -> (i32, i32) {
    %c0_i32 = arith.constant 0 : i32
    %c0_i32_0 = arith.constant 0 : i32
    %c0_i32_1 = arith.constant 0 : i32
    return %c0_i32, %c0_i32_0 : i32, i32
  }
  func.func @transform_2(%arg0: i32) -> (i32, i32) {
    %c0_i32 = arith.constant 0 : i32
    %c0_i32_0 = arith.constant 0 : i32
    %c0_i32_1 = arith.constant 0 : i32
    return %c0_i32, %c0_i32_0 : i32, i32
  }
  func.func @transform_3(%arg0: i32) -> (i32, i32) {
    %c0_i32 = arith.constant 0 : i32
    %c0_i32_0 = arith.constant 0 : i32
    return %c0_i32, %arg0 : i32, i32
  }
}

</mosaic_0001>

<bundles_post_ra>
// kernel: tpu_custom_call.1
= control target key start
LH: loop header
LB: loop body
LE: loop exit
PB: predicated region body
PF: predicated region fallthrough
CT: control target
= control target key end

     0   :  { %vm21_vm0 = vcmask 130048   ;;  %s1169_s0 = inlined_call_operand.vmem [shape: f32[16,128], index: 0, kind: input, shape index: {}]   ;;  %s1170_s1 = inlined_call_operand.vmem [shape: f32[32,16], index: 1, kind: input, shape index: {}]   ;;  %s1171_s2 = inlined_call_operand.vmem [shape: f32[32,32], index: 2, kind: input, shape index: {}]   ;;  %s1172_s3 = inlined_call_operand.hbm [shape: f32[1,128], index: 3, kind: output, shape index: {}]  }
   0x1   :  { %v19_v0 = vld [vmem:[%s1169_s0] sm:$0xff]  ;;  %v20_v1 = vld [vmem:[%s1169_s0 + $0x8] sm:$0xff] }
   0x2   :  { %v15_v2 = vld [vmem:[%s1170_s1] sm:$0xff]  ;;  %v723_v3 = vpack.c.bf16 %v20_v1, %v19_v0 }
   0x3   :  { %703 = vmatprep.mubr.msk.f32.mxu0 %vm21_vm0, %v15_v2 }
   0x4   :  { %8 = vsyncpa [#allocation3], 0  ;;  %724 = vmatprep.subr.bf16.mxu0 %v723_v3  ;;  %v16_v4 = vld [vmem:[%s1170_s1 + $0x8] sm:$0xff]  ;;  %v17_v5 = vld [vmem:[%s1170_s1 + $0x10] sm:$0xff]  ;;  %v798_v39 = vmov 683565275  }
   0x5   :  { %726 = vmatpush3.bf16.msra.mxu0 %v723_v3  ;;  %v18_v6 = vld [vmem:[%s1170_s1 + $0x18] sm:$0xff]  ;;  %v799_v43 = vmov 2475754826   ;;  %v800_v45 = vmov 2131351028   ;;  %vm535_vm13 = vcmask 261120  }
   0x6   :  { %v801_v47 = vmov 2102212464   ;;  %v802_v49 = vmov 920167782   ;;  %v803_v56 = vmov 1326507024  }
   0x8   :  { %704 = vmatmul.mubr.msk.f32.vlgmr.msra.gmra.mrb[0].mxu0 %vm21_vm0, %v16_v4 }
   0x9   :  { %706 = vmatprep.mubr.msk.f32.mxu0 %vm21_vm0, %v17_v5 }
   0xc   :  { %707 = vmatmul.mubr.msk.f32.gmra.mrb[2].mxu0 %vm21_vm0, %v18_v6 }
  0xdb   :  { %v843_v7 = vpop.f32.mrb[0].mxu0 }
  0xdc   :  { %v222_v8 = vand.u32 2147483647, %v843_v7  ;;  %v225_v9 = vand.u32 2139095040, %v843_v7  ;;  %v847_v10 = vpop.f32.mrb[1].mxu0 }
  0xdd   :  { %v119_v11 = vand.u32 2147483647, %v847_v10  ;;  %v122_v12 = vand.u32 2139095040, %v847_v10 }
  0xde   :  { %v226_v13 = vshrl.u32 %v225_v9, 23  ;;  %v229_v14 = vand.u32 8388607, %v222_v8 }
  0xdf   :  { %v123_v15 = vshrl.u32 %v122_v12, 23  ;;  %v126_v16 = vand.u32 8388607, %v119_v11  ;;  %v855_v17 = vpop.f32.mrb[2].mxu0 }
  0xe0   :  { %v669_v18 = vadd.s32 4294967169, %v226_v13  ;;  %v857_v19 = vpop.f32.mrb[3].mxu0  ;;  %v431_v21 = vand.u32 2139095040, %v855_v17  ;;  %v230_v22 = vor.u32 8388608, %v229_v14  ;;  %v428_v26 = vand.u32 2147483647, %v855_v17 }
  0xe1   :  { %v665_v20 = vadd.s32 4294967169, %v123_v15  ;;  %v127_v24 = vor.u32 8388608, %v126_v16  ;;  %v325_v33 = vand.u32 2147483647, %v857_v19 }
  0xe2   :  { %v232_v23 = vadd.s32 1, %v669_v18  ;;  %v432_v27 = vshrl.u32 %v431_v21, 23  ;;  %v862_v34 = vshll.u32 %v230_v22, 8  ;;  %v870_v37 = vand.u32 8388607, %v428_v26 }
  0xe3   :  { %v129_v25 = vadd.s32 1, %v665_v20  ;;  %v866_v36 = vshll.u32 %v127_v24, 8 }
  0xe4   :  { %vm233_vm1 = vcmp.gt.s32.totalorder %v232_v23, 0  ;;  %v677_v29 = vadd.s32 4294967169, %v432_v27 }
  0xe5   :  { %v234_v28 = vsel %vm233_vm1, %v232_v23, 0  ;;  %vm130_vm2 = vcmp.gt.s32.totalorder %v129_v25, 0 }
  0xe6   :  { %v235_v30 = vshrl.u32 %v234_v28, 5  ;;  %v236_v31 = vand.u32 31, %v234_v28  ;;  %v131_v32 = vsel %vm130_vm2, %v129_v25, 0  ;;  %v873_v42 = vadd.s32 1, %v677_v29 }
  0xe7   :  { %v864_v35 = vshrl.u32 %v131_v32, 5  ;;  %v133_v41 = vand.u32 31, %v131_v32 }
  0xe8   :  { %v237_v38 = vsub.s32 32, %v236_v31  ;;  %v239_v40 = vshll.u32 %v798_v39, %v236_v31  ;;  %v242_v44 = vshll.u32 %v799_v43, %v236_v31  ;;  %v245_v46 = vshll.u32 %v800_v45, %v236_v31 }
  0xe9   :  { %v248_v48 = vshll.u32 %v801_v47, %v236_v31  ;;  %v251_v50 = vshll.u32 %v802_v49, %v236_v31  ;;  %vm254_vm3 = vcmp.lt.s32.totalorder %v235_v30, 1  ;;  %vm255_vm4 = vcmp.lt.s32.totalorder %v235_v30, 2 }
  0xea   :  { %v240_v51 = vshrl.u32 %v799_v43, %v237_v38  ;;  %v243_v52 = vshrl.u32 %v800_v45, %v237_v38  ;;  %v246_v53 = vshrl.u32 %v801_v47, %v237_v38  ;;  %v238_v54 = vshrl.u32 %v798_v39, %v237_v38 }
  0xeb   :  { %v249_v55 = vshrl.u32 %v802_v49, %v237_v38  ;;  %v252_v57 = vshrl.u32 %v803_v56, %v237_v38  ;;  %v134_v61 = vsub.s32 32, %v133_v41  ;;  %vm256_vm5 = vcmp.lt.s32.totalorder %v235_v30, 3 }
  0xec   :  { %v241_v58 = vor.u32 %v240_v51, %v239_v40  ;;  %v244_v59 = vor.u32 %v243_v52, %v242_v44  ;;  %v247_v60 = vor.u32 %v246_v53, %v245_v46  ;;  %vm257_vm6 = vcmp.lt.s32.totalorder %v235_v30, 4 }
  0xed   :  { %v250_v62 = vor.u32 %v249_v55, %v248_v48  ;;  %v253_v63 = vor.u32 %v252_v57, %v251_v50  ;;  %v136_v9 = vshll.u32 %v798_v39, %v133_v41  ;;  %v137_v14 = vshrl.u32 %v799_v43, %v134_v61 }
  0xee   :  { %v258_v0 = vsel %vm254_vm3, %v238_v54, %v241_v58  ;;  %v259_v1 = vsel %vm257_vm6, %v247_v60, 2102212464  ;;  %v262_v2 = vsel %vm254_vm3, %v241_v58, %v244_v59  ;;  %v266_v3 = vsel %vm254_vm3, %v244_v59, %v247_v60 }
  0xef   :  { %v260_v4 = vsel %vm256_vm5, %v244_v59, %v259_v1  ;;  %v263_v5 = vsel %vm257_vm6, %v250_v62, 920167782  ;;  %v267_v6 = vsel %vm257_vm6, %v253_v63, 1326507024  ;;  %v139_v15 = vshll.u32 %v799_v43, %v133_v41 }
  0xf0   :  { %v264_v12 = vsel %vm256_vm5, %v247_v60, %v263_v5  ;;  %v268_v13 = vsel %vm256_vm5, %v250_v62, %v267_v6  ;;  %v261_v16 = vsel %vm255_vm4, %v258_v0, %v260_v4  ;;  %v140_v21 = vshrl.u32 %v800_v45, %v134_v61 }
  0xf1   :  { %v265_v18 = vsel %vm255_vm4, %v262_v2, %v264_v12  ;;  %v269_v20 = vsel %vm255_vm4, %v266_v3, %v268_v13  ;;  %v138_v27 = vor.u32 %v137_v14, %v136_v9  ;;  %v142_v29 = vshll.u32 %v800_v45, %v133_v41  ;;  %v531_v12 = vld [vmem:[%s1171_s2] sm:$0xff] }
  0xf2   :  { %v896_v22 = vmul.u32.u64.low %v862_v34, %v269_v20  ;;  %v897_v23 = vmul.u32.u64.high %v862_v34, %v269_v20, %v896_v22  ;;  %v900_v24 = vmul.u32.u64.low %v862_v34, %v265_v18  ;;  %v901_v25 = vmul.u32.u64.high %v862_v34, %v265_v18, %v900_v24  ;;  %717 = vmatprep.mubr.msk.f32.mxu1 %vm535_vm13, %v531_v12 }
  0xf3   :  { %v141_v28 = vor.u32 %v140_v21, %v139_v15  ;;  %v143_v31 = vshrl.u32 %v801_v47, %v134_v61  ;;  %v135_v30 = vshrl.u32 %v798_v39, %v134_v61  ;;  %v145_v32 = vshll.u32 %v801_v47, %v133_v41 }
  0xf4   :  { %v146_v38 = vshrl.u32 %v802_v49, %v134_v61  ;;  %v149_v40 = vshrl.u32 %v803_v56, %v134_v61  ;;  %v277_v44 = vmul.u32 %v862_v34, %v261_v16  ;;  %v148_v48 = vshll.u32 %v802_v49, %v133_v41 }
  0xf5   :  { %v144_v46 = vor.u32 %v143_v31, %v142_v29  ;;  %vm151_vm7 = vcmp.lt.s32.totalorder %v864_v35, 1  ;;  %vm279_vm8 = vc.u32 %v897_v23, %v900_v24  ;;  %v280_v50 = vadd.s32 1, %v901_v25 }
  0xf6   :  { %v147_v51 = vor.u32 %v146_v38, %v145_v32  ;;  %vm152_vm9 = vcmp.lt.s32.totalorder %v864_v35, 2  ;;  %v150_v52 = vor.u32 %v149_v40, %v148_v48  ;;  %vm153_vm10 = vcmp.lt.s32.totalorder %v864_v35, 3 }
  0xf7   :  { %vm154_vm11 = vcmp.lt.s32.totalorder %v864_v35, 4  ;;  %v159_v53 = vsel %vm151_vm7, %v138_v27, %v141_v28  ;;  %v281_v34 = vsel %vm279_vm8, %v280_v50, %v901_v25  ;;  %v163_v55 = vsel %vm151_vm7, %v141_v28, %v144_v46 }
  0xf8   :  { %v156_v54 = vsel %vm154_vm11, %v144_v46, 2102212464  ;;  %v160_v41 = vsel %vm154_vm11, %v147_v51, 920167782  ;;  %v282_v57 = vadd.s32 %v281_v34, %v277_v44  ;;  %v155_v58 = vsel %vm151_vm7, %v135_v30, %v138_v27 }
  0xf9   :  { %v161_v59 = vsel %vm153_vm10, %v144_v46, %v160_v41  ;;  %v164_v60 = vsel %vm154_vm11, %v150_v52, 1326507024  ;;  %v157_v61 = vsel %vm153_vm10, %v141_v28, %v156_v54  ;;  %vm439_vm12 = vcmp.gt.s32.totalorder %v873_v42, 0 }
  0xfa   :  { %v162_v62 = vsel %vm152_vm9, %v159_v53, %v161_v59  ;;  %v165_v63 = vsel %vm153_vm10, %v147_v51, %v164_v60  ;;  %v283_v0 = vadd.s32 536870912, %v282_v57  ;;  %v440_v6 = vsel %vm439_vm12, %v873_v42, 0 }
  0xfb   :  { %v166_v1 = vsel %vm152_vm9, %v163_v55, %v165_v63  ;;  %v926_v2 = vmul.u32.u64.low %v866_v36, %v162_v62  ;;  %v927_v3 = vmul.u32.u64.high %v866_v36, %v162_v62, %v926_v2  ;;  %v328_v9 = vand.u32 2139095040, %v857_v19 }
  0xfc   :  { %v931_v4 = vmul.u32.u64.low %v866_v36, %v166_v1  ;;  %v932_v5 = vmul.u32.u64.high %v866_v36, %v166_v1, %v931_v4  ;;  %v939_v13 = vshrl.u32 %v283_v0, 30  ;;  %v158_v14 = vsel %vm152_vm9, %v155_v58, %v157_v61 }
  0xfd   :  { %v442_v15 = vand.u32 31, %v440_v6  ;;  %v436_v16 = vor.u32 8388608, %v870_v37  ;;  %v177_v20 = vadd.s32 1, %v927_v3  ;;  %v948_v21 = vand.u32 8388607, %v325_v33 }
  0xfe   :  { %v285_v18 = vshll.u32 %v939_v13, 30  ;;  %v174_v22 = vmul.u32 %v866_v36, %v158_v14  ;;  %vm176_vm14 = vc.u32 %v932_v5, %v926_v2  ;;  %v954_v35 = vshrl.u32 %v440_v6, 5 }
  0xff   :  { %v443_v42 = vsub.s32 32, %v442_v15  ;;  %v329_v37 = vshrl.u32 %v328_v9, 23  ;;  %v178_v27 = vsel %vm176_vm14, %v177_v20, %v927_v3  ;;  %v445_v28 = vshll.u32 %v798_v39, %v442_v15 }
 0x100   :  { %v956_v25 = vsub.s32 %v282_v57, %v285_v18  ;;  %v448_v29 = vshll.u32 %v799_v43, %v442_v15  ;;  %v179_v31 = vadd.s32 %v178_v27, %v174_v22  ;;  %v451_v36 = vshll.u32 %v800_v45, %v442_v15 }
 0x101   :  { %v446_v30 = vshrl.u32 %v799_v43, %v443_v42  ;;  %v449_v32 = vshrl.u32 %v800_v45, %v443_v42  ;;  %v452_v40 = vshrl.u32 %v801_v47, %v443_v42  ;;  %v454_v44 = vshll.u32 %v801_v47, %v442_v15 }
 0x102   :  { %v288_v38 = vsub.s32 0, %v956_v25  ;;  %v455_v46 = vshrl.u32 %v802_v49, %v443_v42  ;;  %v180_v48 = vadd.s32 536870912, %v179_v31  ;;  %v457_v52 = vshll.u32 %v802_v49, %v442_v15 }
 0x103   :  { %v447_v50 = vor.u32 %v446_v30, %v445_v28  ;;  %v450_v51 = vor.u32 %v449_v32, %v448_v29  ;;  %v453_v34 = vor.u32 %v452_v40, %v451_v36  ;;  %v458_v41 = vshrl.u32 %v803_v56, %v443_v42 }
 0x104   :  { %v670_v53 = vmin.u32 %v288_v38, %v956_v25  ;;  %v456_v54 = vor.u32 %v455_v46, %v454_v44  ;;  %v278_v55 = vadd.s32 %v900_v24, %v897_v23  ;;  %v973_v57 = vshrl.u32 %v180_v48, 30 }
 0x105   :  { %v975_v58 = vshll.u32 %v436_v16, 8  ;;  %v673_v59 = vadd.s32 4294967169, %v329_v37  ;;  %v459_v61 = vor.u32 %v458_v41, %v457_v52  ;;  %vm460_vm15 = vcmp.lt.s32.totalorder %v954_v35, 1 }
 0x106   :  { %v290_v60 = vclz %v670_v53  ;;  %vm463_vm0 = vcmp.lt.s32.totalorder %v954_v35, 4  ;;  %v182_v62 = vshll.u32 %v973_v57, 30  ;;  %v444_v63 = vshrl.u32 %v798_v39, %v443_v42 }
 0x107   :  { %v465_v0 = vsel %vm463_vm0, %v453_v34, 2102212464  ;;  %v468_v1 = vsel %vm460_vm15, %v447_v50, %v450_v51  ;;  %vm461_vm1 = vcmp.lt.s32.totalorder %v954_v35, 2  ;;  %vm462_vm2 = vcmp.lt.s32.totalorder %v954_v35, 3 }
 0x108   :  { %v671_v23 = vadd.s32 4294967294, %v290_v60  ;;  %v469_v24 = vsel %vm463_vm0, %v456_v54, 920167782  ;;  %v987_v3 = vsub.s32 %v179_v31, %v182_v62  ;;  %v464_v4 = vsel %vm460_vm15, %v444_v63, %v447_v50 }
 0x109   :  { %v470_v6 = vsel %vm462_vm2, %v453_v34, %v469_v24  ;;  %v472_v9 = vsel %vm460_vm15, %v450_v51, %v453_v34  ;;  %v466_v12 = vsel %vm462_vm2, %v450_v51, %v465_v0  ;;  %v473_v15 = vsel %vm463_vm0, %v459_v61, 1326507024 }
 0x10a   :  { %vm672_vm3 = vcmp.lt.s32.totalorder %v671_v23, 0  ;;  %v471_v14 = vsel %vm461_vm1, %v468_v1, %v470_v6  ;;  %v185_v18 = vsub.s32 0, %v987_v3  ;;  %v474_v20 = vsel %vm462_vm2, %v456_v54, %v473_v15 }
 0x10b   :  { %v293_v16 = vsel %vm672_vm3, 0, %v671_v23  ;;  %v335_v42 = vadd.s32 1, %v673_v59  ;;  %v475_v28 = vsel %vm461_vm1, %v472_v9, %v474_v20  ;;  %v467_v51 = vsel %vm461_vm1, %v464_v4, %v466_v12 }
 0x10c   :  { %v294_v22 = vsub.s32 32, %v293_v16  ;;  %v295_v37 = vshll.u32 %v956_v25, %v293_v16  ;;  %v298_v27 = vsub.s32 4294967266, %v293_v16  ;;  %v666_v29 = vmin.u32 %v185_v18, %v987_v3 }
 0x10d   :  { %v999_v31 = vmul.u32.u64.low %v975_v58, %v475_v28  ;;  %v1000_v30 = vmul.u32.u64.high %v975_v58, %v475_v28, %v999_v31  ;;  %vm336_vm4 = vcmp.gt.s32.totalorder %v335_v42, 0  ;;  %v308_v25 = vsub.s32 4, %v939_v13 }
 0x10e   :  { %v296_v32 = vshrl.u32 %v278_v55, %v294_v22  ;;  %v299_v36 = vadd.s32 127, %v298_v27  ;;  %v1003_v38 = vmul.u32.u64.low %v975_v58, %v471_v14  ;;  %v1004_v40 = vmul.u32.u64.high %v975_v58, %v471_v14, %v1003_v38 }
 0x10f   :  { %v187_v44 = vclz %v666_v29  ;;  %v337_v46 = vsel %vm336_vm4, %v335_v42, 0  ;;  %vm224_vm5 = vcmp.lt.s32.totalorder %v843_v7, 0  ;;  %vm1015_vm7 = vcmp.le.f32.partialorder %v222_v8, 0.7853982 }
 0x110   :  { %v297_v48 = vor.u32 %v296_v32, %v295_v37  ;;  %v300_v50 = vshll.u32 %v299_v36, 23  ;;  %v339_v52 = vand.u32 31, %v337_v46  ;;  %vm485_vm6 = vc.u32 %v1000_v30, %v1003_v38 }
 0x111   :  { %v667_v53 = vadd.s32 4294967294, %v187_v44  ;;  %v486_v41 = vadd.s32 1, %v1004_v40  ;;  %v333_v55 = vor.u32 8388608, %v948_v21  ;;  %v1024_v59 = vsel %vm224_vm5, %v308_v25, %v939_v13 }
 0x112   :  { %v301_v54 = vor.u32 4788187, %v300_v50  ;;  %v340_v35 = vsub.s32 32, %v339_v52  ;;  %v175_v60 = vadd.s32 %v926_v2, %v932_v5  ;;  %v483_v8 = vmul.u32 %v975_v58, %v467_v51 }
 0x113   :  { %vm668_vm8 = vcmp.lt.s32.totalorder %v667_v53, 0  ;;  %v304_v62 = vcvt.s32.f32 %v297_v48  ;;  %v487_v0 = vsel %vm485_vm6, %v486_v41, %v1004_v40  ;;  %v1030_v24 = vshrl.u32 %v337_v46, 5 }
 0x114   :  { %v302_v61 = vand.u32 2147483647, %v301_v54  ;;  %v190_v63 = vsel %vm668_vm8, 0, %v667_v53  ;;  %v488_v21 = vadd.s32 %v487_v0, %v483_v8  ;;  %v342_v6 = vshll.u32 %v798_v39, %v339_v52 }
 0x115   :  { %v191_v1 = vsub.s32 32, %v190_v63  ;;  %v195_v23 = vsub.s32 4294967266, %v190_v63  ;;  %v192_v13 = vshll.u32 %v987_v3, %v190_v63  ;;  %v343_v2 = vshrl.u32 %v799_v43, %v340_v35 }
 0x116   :  { %v305_v4 = vmul.f32 %v304_v62, %v302_v61  ;;  %v489_v58 = vadd.s32 536870912, %v488_v21  ;;  %v346_v12 = vshrl.u32 %v800_v45, %v340_v35  ;;  %v345_v15 = vshll.u32 %v799_v43, %v339_v52 }
 0x117   :  { %v193_v5 = vshrl.u32 %v175_v60, %v191_v1  ;;  %v196_v9 = vadd.s32 127, %v195_v23  ;;  %v348_v16 = vshll.u32 %v800_v45, %v339_v52  ;;  %v349_v18 = vshrl.u32 %v801_v47, %v340_v35 }
 0x118   :  { %v306_v14 = vxor.u32 2147483648, %v305_v4  ;;  %v1039_v22 = vshrl.u32 %v489_v58, 30  ;;  %v352_v3 = vshrl.u32 %v802_v49, %v340_v35  ;;  %vm121_vm9 = vcmp.lt.s32.totalorder %v847_v10, 0 }
 0x119   :  { %v194_v20 = vor.u32 %v193_v5, %v192_v13  ;;  %v197_v42 = vshll.u32 %v196_v9, 23  ;;  %v344_v27 = vor.u32 %v343_v2, %v342_v6  ;;  %v351_v28 = vshll.u32 %v801_v47, %v339_v52 }
 0x11a   :  { %v307_v37 = vsel %vm224_vm5, %v306_v14, %v305_v4  ;;  %v355_v43 = vshrl.u32 %v803_v56, %v340_v35  ;;  %vm1052_vm10 = vcmp.le.f32.partialorder %v119_v11, 0.7853982  ;;  %v491_v32 = vshll.u32 %v1039_v22, 30 }
 0x11b   :  { %v310_v45 = vsel %vm1015_vm7, %v843_v7, %v307_v37  ;;  %v198_v31 = vor.u32 4788187, %v197_v42  ;;  %v347_v36 = vor.u32 %v346_v12, %v345_v15  ;;  %v350_v40 = vor.u32 %v349_v18, %v348_v16 }
 0x11c   :  { %758 = vcosq.f32 %v310_v45  ;;  %v353_v25 = vor.u32 %v352_v3, %v351_v28  ;;  %v354_v47 = vshll.u32 %v802_v49, %v339_v52  ;;  %v201_v44 = vcvt.s32.f32 %v194_v20 }
 0x11d   :  { %760 = vsinq.f32 %v310_v45  ;;  %v199_v56 = vand.u32 2147483647, %v198_v31  ;;  %v1058_v46 = vsub.s32 %v488_v21, %v491_v32  ;;  %v205_v48 = vsub.s32 4, %v973_v57 }
 0x11e   :  { %v341_v11 = vshrl.u32 %v798_v39, %v340_v35  ;;  %v356_v50 = vor.u32 %v355_v43, %v354_v47  ;;  %v373_v51 = vshll.u32 %v333_v55, 8  ;;  %vm357_vm11 = vcmp.lt.s32.totalorder %v1030_v24, 1 }
 0x11f   :  { %v202_v53 = vmul.f32 %v201_v44, %v199_v56  ;;  %v494_v54 = vsub.s32 0, %v1058_v46  ;;  %vm360_vm12 = vcmp.lt.s32.totalorder %v1030_v24, 4  ;;  %vm359_vm14 = vcmp.lt.s32.totalorder %v1030_v24, 3 }
 0x120   :  { %v362_v49 = vsel %vm360_vm12, %v350_v40, 2102212464  ;;  %v365_v52 = vsel %vm357_vm11, %v344_v27, %v347_v36  ;;  %v366_v41 = vsel %vm360_vm12, %v353_v25, 920167782  ;;  %vm358_vm15 = vcmp.lt.s32.totalorder %v1030_v24, 2 }
 0x121   :  { %v203_v60 = vxor.u32 2147483648, %v202_v53  ;;  %v678_v8 = vmin.u32 %v494_v54, %v1058_v46  ;;  %v367_v39 = vsel %vm359_vm14, %v350_v40, %v366_v41  ;;  %v361_v35 = vsel %vm357_vm11, %v341_v11, %v344_v27 }
 0x122   :  { %v368_v55 = vsel %vm358_vm15, %v365_v52, %v367_v39  ;;  %v369_v61 = vsel %vm357_vm11, %v347_v36, %v350_v40  ;;  %v370_v62 = vsel %vm360_vm12, %v356_v50, 1326507024  ;;  %v363_v1 = vsel %vm359_vm14, %v347_v36, %v362_v49 }
 0x123   :  { %v204_v63 = vsel %vm121_vm9, %v203_v60, %v202_v53  ;;  %v496_v0 = vclz %v678_v8  ;;  %v371_v23 = vsel %vm359_vm14, %v353_v25, %v370_v62  ;;  %v311_v12 = vsel %vm1015_vm7, 0, %v1024_v59 }
 0x124   :  { %v207_v21 = vsel %vm1052_vm10, %v847_v10, %v204_v63  ;;  %v372_v4 = vsel %vm358_vm15, %v369_v61, %v371_v23  ;;  %v1077_v13 = vmul.u32.u64.low %v373_v51, %v368_v55  ;;  %v1078_v6 = vmul.u32.u64.high %v373_v51, %v368_v55, %v1077_v13 }
 0x125   :  { %762 = vcosq.f32 %v207_v21  ;;  %v679_v2 = vadd.s32 4294967294, %v496_v0  ;;  %v1081_v5 = vmul.u32.u64.low %v373_v51, %v372_v4  ;;  %v1082_v9 = vmul.u32.u64.high %v373_v51, %v372_v4, %v1081_v5 }
 0x126   :  { %v759_v58 = vpop.eup %758  ;;  %764 = vsinq.f32 %v207_v21  ;;  %v206_v15 = vsel %vm121_vm9, %v205_v48, %v973_v57  ;;  %v364_v16 = vsel %vm358_vm15, %v361_v35, %v363_v1  ;;  %v383_v20 = vadd.s32 1, %v1078_v6 }
 0x127   :  { %v761_v14 = vpop.eup %760  ;;  %vm680_vm0 = vcmp.lt.s32.totalorder %v679_v2, 0  ;;  %v315_v42 = vand.u32 3, %v311_v12  ;;  %v321_v27 = vxor.u32 2147483648, %v759_v58  ;;  %v380_v43 = vmul.u32 %v373_v51, %v364_v16 }
 0x128   :  { %v499_v18 = vsel %vm680_vm0, 0, %v679_v2  ;;  %v318_v37 = vxor.u32 2147483648, %v761_v14  ;;  %vm382_vm1 = vc.u32 %v1082_v9, %v1077_v13  ;;  %v208_v34 = vsel %vm1052_vm10, 0, %v206_v15 }
 0x129   :  { %v504_v3 = vsub.s32 4294967266, %v499_v18  ;;  %v500_v28 = vsub.s32 32, %v499_v18  ;;  %v384_v59 = vsel %vm382_vm1, %v383_v20, %v1078_v6  ;;  %v484_v24 = vadd.s32 %v1003_v38, %v1000_v30 }
 0x12a   :  { %v385_v45 = vadd.s32 %v384_v59, %v380_v43  ;;  %vm317_vm2 = vcmp.eq.s32.totalorder %v315_v42, 0  ;;  %vm320_vm3 = vcmp.eq.s32.totalorder %v315_v42, 2  ;;  %v212_v32 = vand.u32 3, %v208_v34 }
 0x12b   :  { %v505_v57 = vadd.s32 127, %v504_v3  ;;  %v319_v36 = vsel %vm317_vm2, %v759_v58, %v318_v37  ;;  %v322_v40 = vsel %vm320_vm3, %v321_v27, %v761_v14  ;;  %v502_v25 = vshrl.u32 %v484_v24, %v500_v28 }
 0x12c   :  { %v386_v47 = vadd.s32 536870912, %v385_v45  ;;  %v501_v44 = vshll.u32 %v1058_v46, %v499_v18  ;;  %vm316_vm4 = vcmp.lt.s32.totalorder %v315_v42, 2  ;;  %vm217_vm5 = vcmp.eq.s32.totalorder %v212_v32, 2 }
 0x12d   :  { %v506_v31 = vshll.u32 %v505_v57, 23  ;;  %v323_v51 = vsel %vm316_vm4, %v319_v36, %v322_v40  ;;  %vm314_vm6 = vweird.f32 %v843_v7  ;;  %vm214_vm7 = vcmp.eq.s32.totalorder %v212_v32, 0 }
 0x12e   :  { %v387_v11 = vshrl.u32 %v386_v47, 30  ;;  %v503_v30 = vor.u32 %v502_v25, %v501_v44  ;;  %vm213_vm8 = vcmp.lt.s32.totalorder %v212_v32, 2  ;;  %v1102_v52 = vsel %vm314_vm6, nan, %v323_v51 }
 0x12f   :  { %v763_v56 = vpop.eup %762  ;;  %v507_v48 = vor.u32 4788187, %v506_v31  ;;  %vm211_vm9 = vweird.f32 %v847_v10  ;;  %vm430_vm11 = vcmp.lt.s32.totalorder %v855_v17, 0  ;;  %v381_v23 = vadd.s32 %v1077_v13, %v1082_v9 }
 0x130   :  { %v765_v29 = vpop.eup %764  ;;  %v218_v50 = vxor.u32 2147483648, %v763_v56  ;;  %v388_v38 = vshll.u32 %v387_v11, 30  ;;  %v510_v39 = vcvt.s32.f32 %v503_v30  ;;  %vm1116_vm12 = vcmp.le.f32.partialorder %v428_v26, 0.7853982  ;;  %v532_v30 = vld [vmem:[%s1171_s2 + $0x8] sm:$0xff] }
 0x131   :  { %v215_v53 = vxor.u32 2147483648, %v765_v29  ;;  %v508_v41 = vand.u32 2147483647, %v507_v48  ;;  %v514_v18 = vsub.s32 4, %v1039_v22  ;;  %vm327_vm14 = vcmp.lt.s32.totalorder %v857_v19, 0 }
 0x132   :  { %v219_v54 = vsel %vm217_vm5, %v218_v50, %v765_v29  ;;  %v389_v46 = vsub.s32 %v385_v45, %v388_v38  ;;  %vm1130_vm15 = vcmp.le.f32.partialorder %v325_v33, 0.7853982  ;;  %v411_v27 = vsub.s32 4, %v387_v11  ;;  %v533_v38 = vld [vmem:[%s1171_s2 + $0x10] sm:$0xff] }
 0x133   :  { %v216_v49 = vsel %vm214_vm7, %v763_v56, %v215_v53  ;;  %v511_v55 = vmul.f32 %v510_v39, %v508_v41  ;;  %v515_v42 = vsel %vm430_vm11, %v514_v18, %v1039_v22  ;;  %vm520_vm5 = vweird.f32 %v855_v17 }
 0x134   :  { %v220_v60 = vsel %vm213_vm8, %v216_v49, %v219_v54  ;;  %v391_v35 = vsub.s32 0, %v389_v46  ;;  %v517_v34 = vsel %vm1116_vm12, 0, %v515_v42  ;;  %v412_v57 = vsel %vm327_vm14, %v411_v27, %v387_v11 }
 0x135   :  { %v1105_v8 = vsel %vm211_vm9, nan, %v220_v60  ;;  %v512_v63 = vxor.u32 2147483648, %v511_v55  ;;  %v521_v59 = vand.u32 3, %v517_v34  ;;  %v414_v45 = vsel %vm1130_vm15, 0, %v412_v57 }
 0x136   :  { %v727_v7 = vpack.c.bf16 %v1102_v52, %v1105_v8  ;;  %v674_v61 = vmin.u32 %v391_v35, %v389_v46  ;;  %v418_v31 = vand.u32 3, %v414_v45  ;;  %vm417_vm7 = vweird.f32 %v857_v19 }
 0x137   :  { %v513_v10 = vsel %vm430_vm11, %v512_v63, %v511_v55  ;;  %vm523_vm0 = vcmp.eq.s32.totalorder %v521_v59, 0  ;;  %vm526_vm1 = vcmp.eq.s32.totalorder %v521_v59, 2  ;;  %vm522_vm2 = vcmp.lt.s32.totalorder %v521_v59, 2 }
 0x138   :  { %728 = vmatprep.subr.bf16.mxu1 %v727_v7  ;;  %v393_v62 = vclz %v674_v61  ;;  %v516_v12 = vsel %vm1116_vm12, %v855_v17, %v513_v10  ;;  %vm423_vm3 = vcmp.eq.s32.totalorder %v418_v31, 2  ;;  %vm420_vm4 = vcmp.eq.s32.totalorder %v418_v31, 0  ;;  %v534_v17 = vld [vmem:[%s1171_s2 + $0x18] sm:$0xff]  ;;  %s804_s2 = smov [#allocation2]  }
 0x139   :  { %730 = vmatpush3.bf16.msra.mxu1 %v727_v7  ;;  %766 = vcosq.f32 %v516_v12  ;;  %vm419_vm6 = vcmp.lt.s32.totalorder %v418_v31, 2  ;;  %s653_s30 = sshll.u32 %s804_s2, 4  ;;  %s654_s30 = int_to_ptr.vmem [resolvable:$true] %s653_s30 }
 0x13a   :  { %v675_v0 = vadd.s32 4294967294, %v393_v62  ;;  %768 = vsinq.f32 %v516_v12  ;;  %s774_s4 = scalar_lea.vmem %s654_s30, 16  ;;  %s778_s5 = scalar_lea.vmem %s654_s30, 32 }
 0x13b   :  { %p775_p0 = scmp.ne.s32.totalorder %s654_s30, %s774_s4  ;;  %p779_p1 = scmp.lt.s32.totalorder %s654_s30, %s654_s30 }
 0x13c   :  { %vm676_vm10 = vcmp.lt.s32.totalorder %v675_v0, 0  ;;  %p780_p2 = scmp.lt.s32.totalorder %s778_s5, %s774_s4 }
 0x13d   :  { %v396_v1 = vsel %vm676_vm10, 0, %v675_v0 }
 0x13e   :  { %v397_v21 = vsub.s32 32, %v396_v1  ;;  %v401_v4 = vsub.s32 4294967266, %v396_v1  ;;  %v398_v2 = vshll.u32 %v389_v46, %v396_v1  ;;  %p781_p3 = por %p780_p2, %p779_p1 }
 0x140   :  { %v399_v5 = vshrl.u32 %v381_v23, %v397_v21  ;;  %v402_v58 = vadd.s32 127, %v401_v4  ;;  %p782_p4 = pnand %p781_p3, %p775_p0 }
 0x142   :  { %v400_v14 = vor.u32 %v399_v5, %v398_v2  ;;  %v403_v15 = vshll.u32 %v402_v58, 23 }
 0x143   :  { %v767_v43 = vpop.eup %766 }
 0x144   :  { %v404_v16 = vor.u32 4788187, %v403_v15  ;;  %v407_v9 = vcvt.s32.f32 %v400_v14  ;;  %v769_v22 = vpop.eup %768  ;;  %v527_v33 = vxor.u32 2147483648, %v767_v43 }
 0x145   :  { %v524_v24 = vxor.u32 2147483648, %v769_v22 }
 0x146   :  { %v405_v13 = vand.u32 2147483647, %v404_v16  ;;  %v528_v36 = vsel %vm526_vm1, %v527_v33, %v769_v22 }
 0x147   :  { %v525_v32 = vsel %vm523_vm0, %v767_v43, %v524_v24 }
 0x148   :  { %v408_v26 = vmul.f32 %v407_v9, %v405_v13  ;;  %v529_v56 = vsel %vm522_vm2, %v525_v32, %v528_v36 }
 0x149   :  { %v530_v11 = vsel %vm520_vm5, nan, %v529_v56 }
 0x14a   :  { %v409_v20 = vxor.u32 2147483648, %v408_v26 }
 0x14c   :  { %v410_v37 = vsel %vm327_vm14, %v409_v20, %v408_v26 }
 0x14d   :  { %v413_v28 = vsel %vm1130_vm15, %v857_v19, %v410_v37 }
 0x14e   :  { %770 = vcosq.f32 %v413_v28 }
 0x14f   :  { %772 = vsinq.f32 %v413_v28 }
 0x158   :  { %v771_v40 = vpop.eup %770 }
 0x159   :  { %v773_v25 = vpop.eup %772  ;;  %v424_v47 = vxor.u32 2147483648, %v771_v40 }
 0x15a   :  { %v421_v44 = vxor.u32 2147483648, %v773_v25 }
 0x15b   :  { %v425_v29 = vsel %vm423_vm3, %v424_v47, %v773_v25 }
 0x15c   :  { %v422_v48 = vsel %vm420_vm4, %v771_v40, %v421_v44 }
 0x15d   :  { %v426_v50 = vsel %vm419_vm6, %v422_v48, %v425_v29 }
 0x15e   :  { %v427_v51 = vsel %vm417_vm7, nan, %v426_v50 }
 0x15f   :  { %v731_v53 = vpack.c.bf16 %v530_v11, %v427_v51 }
 0x161   :  { %732 = vmatprep.subr.bf16.mxu1 %v731_v53 }
 0x162   :  { %734 = vmatpush3.bf16.msra.mxu1 %v731_v53 }
 0x165   :  { %718 = vmatmul.mubr.msk.f32.vlgmr.msra.gmra.mrb[0].mxu1 %vm535_vm13, %v532_v30 }
 0x166   :  { %720 = vmatprep.mubr.msk.f32.mxu1 %vm535_vm13, %v533_v38 }
 0x169   :  { %721 = vmatmul.mubr.msk.f32.gmra.mrb[2].mxu1 %vm535_vm13, %v534_v17 }
 0x238   :  { %v719_v19 = vpop.f32.mrb[0].mxu1 }
 0x239   :  { %v634_v54 = vmul.f32 %v719_v19, %v1102_v52  ;;  %v614_v49 = vpop.f32.mrb[1].mxu1 }
 0x23a   :  { %v633_v41 = vmul.f32 %v614_v49, %v1105_v8 }
 0x23c   :  { %v637_v46 = vadd.f32 %v634_v54, %v633_v41  ;;  %v722_v60 = vpop.f32.mrb[2].mxu1 }
 0x23d   :  { %v624_v39 = vpop.f32.mrb[3].mxu1  ;;  %v636_v7 = vmul.f32 %v722_v60, %v530_v11 }
 0x23e   :  { %v635_v35 = vmul.f32 %v624_v39, %v427_v51 }
 0x240   :  { %v638_v55 = vadd.f32 %v637_v46, %v635_v35 }
 0x242   :  { %v639_v61 = vadd.f32 %v638_v55, %v636_v7 }
 0x244   :  { %v640_v62 = vrot.slane %v639_v61, 4 }
 0x246   :  { %v641_v63 = vadd.f32 %v640_v62, %v639_v61 }
 0x248   :  { %v642_v0 = vrot.slane %v641_v63, 2 }
 0x24a   :  { %v643_v1 = vadd.f32 %v642_v0, %v641_v63 }
 0x24c   :  { %v644_v10 = vrot.slane %v643_v1, 1 }
 0x24e   :  { %v645_v23 = vadd.f32 %v644_v10, %v643_v1 }
 0x250   :  { %646 = vst [vmem:[#allocation2] sm:$0x1] %v645_v23 }
 0x251   :  { %785 = shalt.err (!%p782_p4)
}
 0x252   :  { %s786_s8 = scalar_lea.hbm %s1172_s3, 16 }
 0x253   :  { %p787_p5 = scmp.ne.s32.totalorder %s1172_s3, %s786_s8  ;;  %p790_p6 = scmp.lt.u32.totalorder %s786_s8, %s1172_s3 }
 0x255   :  { %p792_p7 = pnand %p790_p6, %p787_p5 }
 0x257   :  { %795 = shalt.err (!%p792_p7)
}
 0x258   :  { %656 = dma.vmem_to_hbm [thread:$0]  %s654_s30, 16, %s1172_s3, [#allocation3]  }
 0x259   :  { %796 = dma.done.wait [#allocation3], 16  }
 0x25a   :  { %797 = vsyncadd [#allocation3], 4294967280 }
 0x25b   :  { %660 = vsyncpa [#allocation3], 1 }

</bundles_post_ra>
